<compile_context>
chip_gen: v6e
topology: v6e:2x2x1
jax: 0.10.0
libtpu: 0.0.40
codegen_flags: <defaults>
</compile_context>

<pallas_src>
import functools
import math

import jax
import jax.numpy as jnp
from jax.experimental import pallas as pl
from jax.experimental.pallas import tpu as pltpu


def _round_up(x, m):
    return ((x + m - 1) // m) * m


# Frames of context kept on each side of a time tile. Must be >= 8 (receptive
# field of entry conv + dilations 1,2,4); 64 keeps every in-kernel array width
# a multiple of 128 lanes so rolls/slices/stores stay lane-aligned.
_HALO = 64


# ----------------------------------------------------------------------------
# In-kernel helpers (everything channel/freq-major, time on lanes)
# ----------------------------------------------------------------------------
def _spectrogram_t(ch, dftT_ref, melfbT_ref, *, start, width, oversample):
    """Mel power spectrogram for `width` frames, shape (n_mels_p, width).

    ch: (hop, Wc) f32 de-interleaved waveform chunks (chunk index on lanes).
    Frame m starts at chunk column `start + m`; the hop-sized sub-blocks of
    each n_fft frame are assembled with static lane slices + a sublane concat.
    The Hann window is folded into dftT (2*n_freq_p, n_fft).
    """
    frames = jnp.concatenate(
        [ch[:, start + q:start + q + width] for q in range(oversample)], axis=0)
    re_im = jnp.dot(dftT_ref[...], frames, preferred_element_type=jnp.float32)
    nfp = melfbT_ref.shape[1]
    re = re_im[:nfp, :]
    im = re_im[nfp:, :]
    power = re * re + im * im                                  # |STFT|^2 (power=2.0)
    return jnp.dot(melfbT_ref[...], power, preferred_element_type=jnp.float32)


def _conv3(x, w_ref, b_ref, dil):
    """'same' Conv1d, kernel 3, dilation `dil`, channel-major (C, W).

    Time shifts are circular lane rolls (overlap-save): wrapped values only
    corrupt the outer <= 8 frames of the tile halo, which are never stored.
    Signal-boundary zero padding is handled by the caller's validity mask.
    """
    w = x.shape[1]
    xb = x.astype(jnp.bfloat16)
    x_m = pltpu.roll(xb, shift=dil, axis=1)                    # x[t - dil]
    x_p = pltpu.roll(xb, shift=w - dil, axis=1)                # x[t + dil]
    x3 = jnp.concatenate([x_m, xb, x_p], axis=0)               # (3*Cin, W) taps [k0|k1|k2]
    y = jnp.dot(w_ref[...], x3, preferred_element_type=jnp.float32)
    return y + b_ref[...]


# ----------------------------------------------------------------------------
# Pass 1: per-utterance sum(mel^2) (norm denominator)
# ----------------------------------------------------------------------------
def _mel_sumsq_kernel(chunks_ref, dftT_ref, melfbT_ref, out_ref, *,
                      tile_t, oversample):
    @pl.when(pl.program_id(1) == 0)
    def _():
        out_ref[...] = jnp.zeros_like(out_ref)

    # Central tile_t frames only (no halo): halo frames would be double counted.
    mel = _spectrogram_t(chunks_ref[...], dftT_ref, melfbT_ref,
                         start=_HALO, width=tile_t, oversample=oversample)
    # Frames past the true utterance length come from zero-padded waveform, so
    # their mel is exactly zero and contributes nothing -> no mask needed.
    out_ref[...] = out_ref[...] + jnp.sum(mel * mel)


# ----------------------------------------------------------------------------
# Pass 2: mel (with halo) -> norm -> entry Conv1d -> residual ConvBlock
# ----------------------------------------------------------------------------
def _mel_conv_kernel(chunks_ref, dftT_ref, melfbT_ref, inv_ref,
                     w1_ref, b1_ref, wd1_ref, bd1_ref, wd2_ref, bd2_ref,
                     wd3_ref, bd3_ref, alphas_ref, out_ref, *,
                     tile_t, oversample, n_valid):
    width = tile_t + 2 * _HALO

    mel = _spectrogram_t(chunks_ref[...], dftT_ref, melfbT_ref,
                         start=0, width=width, oversample=oversample)
    # per-utterance normalization: x * min(rsqrt(mean_t(sum_mel(x^2))), 1e5)
    mel = mel * inv_ref[pl.program_id(0)]

    # Validity mask over global frame index, built ONCE per tile (single iota)
    # and reused by every conv layer: enforces the per-layer zero 'same'
    # padding at the true utterance boundaries.
    g0 = pl.program_id(1) * tile_t - _HALO
    g = jax.lax.broadcasted_iota(jnp.int32, (1, width), 1) + g0
    maskf = jnp.logical_and(g >= 0, g < n_valid).astype(jnp.float32)

    a0 = alphas_ref[0]
    a1 = alphas_ref[1]
    a2 = alphas_ref[2]

    h0 = _conv3(mel, w1_ref, b1_ref, 1)                        # entry Conv1d
    x = jnp.where(h0 >= 0.0, h0, a0 * h0) * maskf              # PReLU + boundary mask
    h = _conv3(x, wd1_ref, bd1_ref, 1)
    x = jnp.where(h >= 0.0, h, a1 * h) * maskf
    h = _conv3(x, wd2_ref, bd2_ref, 2)
    x = jnp.where(h >= 0.0, h, a2 * h) * maskf
    h = _conv3(x, wd3_ref, bd3_ref, 4)
    y = h + h0                                                 # ConvBlock residual

    out_ref[...] = y[:, _HALO:_HALO + tile_t].astype(out_ref.dtype)


# ----------------------------------------------------------------------------
# Host-side glue: mel filterbank, DFT matrix, chunking, weight packing.
# ----------------------------------------------------------------------------
def make_mel_filterbank(n_freqs, n_mels, sample_rate, f_min=0.0, f_max=None):
    # torchaudio.functional.melscale_fbanks defaults: htk scale, norm=None.
    if f_max is None:
        f_max = sample_rate / 2.0
    all_freqs = jnp.linspace(0.0, sample_rate / 2.0, n_freqs)

    def hz_to_mel(f):
        return 2595.0 * jnp.log10(1.0 + f / 700.0)

    def mel_to_hz(m):
        return 700.0 * (jnp.power(10.0, m / 2595.0) - 1.0)

    m_pts = jnp.linspace(hz_to_mel(jnp.asarray(f_min)),
                         hz_to_mel(jnp.asarray(f_max)), n_mels + 2)
    f_pts = mel_to_hz(m_pts)
    f_diff = f_pts[1:] - f_pts[:-1]
    slopes = f_pts[None, :] - all_freqs[:, None]               # (n_freqs, n_mels+2)
    down = -slopes[:, :-2] / f_diff[:-1]
    up = slopes[:, 2:] / f_diff[1:]
    fb = jnp.maximum(0.0, jnp.minimum(down, up))               # (n_freqs, n_mels)
    return fb.astype(jnp.float32)


def init_params(key, n_mels, out_channels):
    ks = jax.random.split(key, 8)

    def conv_w(k, cout, cin):
        scale = 1.0 / math.sqrt(cin * 3)
        return scale * jax.random.normal(k, (cout, cin, 3), jnp.float32)

    def conv_b(k, cout):
        return 0.01 * jax.random.normal(k, (cout,), jnp.float32)

    p = {"w1": conv_w(ks[0], out_channels, n_mels),
         "b1": conv_b(ks[1], out_channels)}
    for i in range(3):
        p[f"wd{i + 1}"] = conv_w(ks[2 + 2 * i], out_channels, out_channels)
        p[f"bd{i + 1}"] = conv_b(ks[3 + 2 * i], out_channels)
    p["alphas"] = jnp.full((3,), 0.25, jnp.float32)            # PReLU default init
    return p


def mel_adapter_forward(x, params, *, n_mels, out_channels, ds_factor,
                        oversample=2, sample_rate=24000, t_tile=1024):
    """x: (B, 1, L) float32 waveform. Returns (B, out_channels, T) float32."""
    B, _, L = x.shape
    C = out_channels
    assert C % 8 == 0, "output_channels must be a multiple of 8"
    hop = ds_factor
    n_fft = oversample * hop
    n_freq = n_fft // 2 + 1
    pad_left = (n_fft - hop) // 2

    r = L % hop
    pad_r = (hop - r) % hop
    T = (L + pad_r) // hop                                     # true frame count

    # ---- time tiling --------------------------------------------------------
    tile_t = min(_round_up(max(t_tile, 128), 128), _round_up(T, 128))
    n_tiles = pl.cdiv(T, tile_t)
    t_pad = n_tiles * tile_t
    wc = tile_t + 2 * _HALO + (oversample - 1)                 # chunks per tile window

    # ---- lane-dense, de-interleaved per-tile chunk windows ------------------
    # Zero padding (left: halo + pad_left, right: pad + pad_right + tile pad)
    # matches F.pad's zero padding and MelSpectrogram's center=False framing,
    # and makes mel exactly zero outside the valid frame range.
    n_chunks = t_pad + 2 * _HALO + (oversample - 1)
    left = _HALO * hop + pad_left
    right = n_chunks * hop - left - L
    xw = jnp.squeeze(x, axis=1)                                # (B, L)
    xp = jnp.pad(xw, ((0, 0), (left, right)))
    xt = jnp.transpose(xp.reshape(B, n_chunks, hop), (0, 2, 1))  # (B, hop, n_chunks)
    idx = jnp.arange(n_tiles)[:, None] * tile_t + jnp.arange(wc)[None, :]
    chunkwin = jnp.transpose(xt[:, :, idx], (0, 2, 1, 3))      # (B, n_tiles, hop, wc)

    # ---- constant matrices (transposed: freq / mel on sublanes) -------------
    n_freq_p = _round_up(n_freq, 8)
    n_mels_p = _round_up(n_mels, 8)
    n = jnp.arange(n_fft, dtype=jnp.float32)
    window = 0.5 - 0.5 * jnp.cos(2.0 * math.pi * n / n_fft)    # periodic Hann
    f = jnp.arange(n_freq_p, dtype=jnp.float32)
    ang = 2.0 * math.pi * f[:, None] * n[None, :] / n_fft
    fmask = (f < n_freq).astype(jnp.float32)[:, None]
    dftT = jnp.concatenate([fmask * jnp.cos(ang) * window[None, :],
                            fmask * jnp.sin(ang) * window[None, :]],
                           axis=0).astype(jnp.float32)         # (2*n_freq_p, n_fft)
    mel_fb = make_mel_filterbank(n_freq, n_mels, sample_rate)  # (n_freq, n_mels)
    melfbT = jnp.pad(mel_fb.T, ((0, n_mels_p - n_mels),
                                (0, n_freq_p - n_freq))).astype(jnp.float32)

    # ---- pack conv weights: (Cout, Cin, 3) -> (Cout, 3*Cin_pad) bf16 ---------
    def pack_w(w, cin_pad):
        cout, cin, _ = w.shape
        w = jnp.pad(w, ((0, 0), (0, cin_pad - cin), (0, 0)))
        return jnp.transpose(w, (0, 2, 1)).reshape(cout, 3 * cin_pad).astype(jnp.bfloat16)

    w1 = pack_w(params["w1"], n_mels_p)
    b1 = params["b1"].reshape(C, 1).astype(jnp.float32)
    wd = [pack_w(params[f"wd{i + 1}"], C) for i in range(3)]
    bd = [params[f"bd{i + 1}"].reshape(C, 1).astype(jnp.float32) for i in range(3)]

    chunk_spec = pl.BlockSpec((None, None, hop, wc), lambda b, t: (b, t, 0, 0))
    dft_spec = pl.BlockSpec((2 * n_freq_p, n_fft), lambda b, t: (0, 0))
    melfb_spec = pl.BlockSpec((n_mels_p, n_freq_p), lambda b, t: (0, 0))
    smem_spec = pl.BlockSpec(memory_space=pltpu.MemorySpace.SMEM)

    def wspec(shape):
        return pl.BlockSpec(shape, lambda b, t: (0, 0))

    # ---- pass 1: per-utterance sum(mel^2) ------------------------------------
    sumsq = pl.pallas_call(
        functools.partial(_mel_sumsq_kernel, tile_t=tile_t, oversample=oversample),
        out_shape=jax.ShapeDtypeStruct((B, 1, 1), jnp.float32),
        grid=(B, n_tiles),
        in_specs=[chunk_spec, dft_spec, melfb_spec],
        out_specs=pl.BlockSpec((None, 1, 1), lambda b, t: (b, 0, 0)),
        compiler_params=pltpu.CompilerParams(
            dimension_semantics=("parallel", "arbitrary")),
    )(chunkwin, dftT, melfbT)

    # norm = sqrt(mean_t(sum_mel(mel^2))); inv = 1 / clamp(norm, 1e-5)
    inv = jnp.minimum(jax.lax.rsqrt(sumsq[:, 0, 0] / jnp.float32(T)), 1e5)  # (B,)

    # ---- pass 2: mel (halo) -> norm -> entry conv -> residual ConvBlock ------
    out = pl.pallas_call(
        functools.partial(_mel_conv_kernel, tile_t=tile_t,
                          oversample=oversample, n_valid=T),
        out_shape=jax.ShapeDtypeStruct((B, C, t_pad), jnp.bfloat16),
        grid=(B, n_tiles),
        in_specs=[chunk_spec, dft_spec, melfb_spec, smem_spec,
                  wspec((C, 3 * n_mels_p)), wspec((C, 1)),
                  wspec((C, 3 * C)), wspec((C, 1)),
                  wspec((C, 3 * C)), wspec((C, 1)),
                  wspec((C, 3 * C)), wspec((C, 1)),
                  smem_spec],
        out_specs=pl.BlockSpec((None, C, tile_t), lambda b, t: (b, 0, t)),
        compiler_params=pltpu.CompilerParams(
            dimension_semantics=("parallel", "parallel")),
    )(chunkwin, dftT, melfbT, inv,
      w1, b1, wd[0], bd[0], wd[1], bd[1], wd[2], bd[2],
      params["alphas"])

    # (B, C, T) float32 to match the PyTorch module's output layout/dtype.
    return out[:, :, :T].astype(jnp.float32)


if __name__ == "__main__":
    key = jax.random.PRNGKey(0)
    k_x, k_p = jax.random.split(key)

    # small shapes consistent with the module
    n_mels = 16
    out_channels = 32
    ds_factor = 8
    oversample = 2
    B, L = 2, 160

    x = jax.random.normal(k_x, (B, 1, L), jnp.float32)
    params = init_params(k_p, n_mels, out_channels)

    y = mel_adapter_forward(
        x, params,
        n_mels=n_mels, out_channels=out_channels,
        ds_factor=ds_factor, oversample=oversample,
    )
    y = jax.block_until_ready(y)

    # expected: (B, out_channels, T) with T = (L + pad) // ds_factor = 20
    assert y.shape == (B, out_channels, 20), y.shape
    assert bool(jnp.all(jnp.isfinite(y))), "non-finite output"
    print("KERNEL_OK")
</pallas_src>

<mosaic_0001>
module attributes {stable_mosaic.version = 11 : i64} {
  func.func @_mel_sumsq_kernel(%arg0: i32, %arg1: i32, %arg2: memref<1x1x8x257xf32, #tpu.memory_space<vmem>>, %arg3: memref<32x16xf32, #tpu.memory_space<vmem>>, %arg4: memref<16x16xf32, #tpu.memory_space<vmem>>, %arg5: memref<1x1x1xf32, #tpu.memory_space<vmem>>) attributes {dimension_semantics = [#tpu.dimension_semantics<parallel>, #tpu.dimension_semantics<arbitrary>], iteration_bounds = array<i64: 2, 1>, scalar_prefetch = 0 : i64, scratch_operands = 0 : i64, tpu.core_type = #tpu.core_type<tc>, window_params = [{transform_indices = @transform_0, window_bounds = array<i64: 1, 1, 8, 257>}, {pipeline_mode = #tpu.pipeline_mode<synchronous>, transform_indices = @transform_1, window_bounds = array<i64: 32, 16>}, {pipeline_mode = #tpu.pipeline_mode<synchronous>, transform_indices = @transform_2, window_bounds = array<i64: 16, 16>}, {transform_indices = @transform_3, window_bounds = array<i64: 1, 1, 1>}]} {
    %c0_i32 = arith.constant 0 : i32
    %0 = arith.cmpi eq, %arg1, %c0_i32 : i32
    %1 = arith.extui %0 : i1 to i32
    %c0_i32_0 = arith.constant 0 : i32
    %2 = arith.cmpi ne, %1, %c0_i32_0 : i32
    scf.if %2 {
      %cst_16 = arith.constant 0.000000e+00 : f32
      %29 = vector.broadcast %cst_16 : f32 to vector<1x1xf32>
      %c0_17 = arith.constant 0 : index
      %c0_18 = arith.constant 0 : index
      %c0_19 = arith.constant 0 : index
      %30 = vector.load %arg5[%c0_17, %c0_18, %c0_19] : memref<1x1x1xf32, #tpu.memory_space<vmem>>, vector<1x1x1xf32>
      %31 = vector.shape_cast %30 : vector<1x1x1xf32> to vector<1x1xf32>
      %32 = vector.shape_cast %29 : vector<1x1xf32> to vector<1x1x1xf32>
      tpu.vector_store %arg5[%c0_17, %c0_18, %c0_19], %32 {strides = array<i32>} : memref<1x1x1xf32, #tpu.memory_space<vmem>>, vector<1x1x1xf32>,
    } else {
    }
    %c0 = arith.constant 0 : index
    %c0_1 = arith.constant 0 : index
    %c0_2 = arith.constant 0 : index
    %c0_3 = arith.constant 0 : index
    %3 = vector.load %arg2[%c0, %c0_1, %c0_2, %c0_3] : memref<1x1x8x257xf32, #tpu.memory_space<vmem>>, vector<1x1x8x257xf32>
    %4 = vector.shape_cast %3 : vector<1x1x8x257xf32> to vector<8x257xf32>
    %5 = vector.extract_strided_slice %4 {offsets = [0, 64], sizes = [8, 128], strides = [1, 1]} : vector<8x257xf32> to vector<8x128xf32>
    %6 = vector.extract_strided_slice %4 {offsets = [0, 65], sizes = [8, 128], strides = [1, 1]} : vector<8x257xf32> to vector<8x128xf32>
    %7 = tpu.concatenate %5, %6 in 0 : vector<8x128xf32>, vector<8x128xf32> -> vector<16x128xf32>
    %c0_4 = arith.constant 0 : index
    %c0_5 = arith.constant 0 : index
    %8 = vector.load %arg3[%c0_4, %c0_5] : memref<32x16xf32, #tpu.memory_space<vmem>>, vector<32x16xf32>
    %cst = arith.constant dense<0.000000e+00> : vector<32x128xf32>
    %9 = tpu.matmul %8, %7, %cst {dimension_numbers = #tpu.dot_dimension_numbers<[1], [0], [0], [1], [0, 0, 1, 1], [], []>} : vector<32x16xf32>, vector<16x128xf32>, vector<32x128xf32> -> vector<32x128xf32>
    %10 = vector.extract_strided_slice %9 {offsets = [0, 0], sizes = [16, 128], strides = [1, 1]} : vector<32x128xf32> to vector<16x128xf32>
    %11 = vector.extract_strided_slice %9 {offsets = [16, 0], sizes = [16, 128], strides = [1, 1]} : vector<32x128xf32> to vector<16x128xf32>
    %12 = arith.mulf %10, %10 : vector<16x128xf32>
    %13 = arith.mulf %11, %11 : vector<16x128xf32>
    %14 = arith.addf %12, %13 : vector<16x128xf32>
    %c0_6 = arith.constant 0 : index
    %c0_7 = arith.constant 0 : index
    %15 = vector.load %arg4[%c0_6, %c0_7] : memref<16x16xf32, #tpu.memory_space<vmem>>, vector<16x16xf32>
    %cst_8 = arith.constant dense<0.000000e+00> : vector<16x128xf32>
    %16 = tpu.matmul %15, %14, %cst_8 {dimension_numbers = #tpu.dot_dimension_numbers<[1], [0], [0], [1], [0, 0, 1, 1], [], []>} : vector<16x16xf32>, vector<16x128xf32>, vector<16x128xf32> -> vector<16x128xf32>
    %c0_9 = arith.constant 0 : index
    %c0_10 = arith.constant 0 : index
    %c0_11 = arith.constant 0 : index
    %17 = vector.load %arg5[%c0_9, %c0_10, %c0_11] : memref<1x1x1xf32, #tpu.memory_space<vmem>>, vector<1x1x1xf32>
    %18 = vector.shape_cast %17 : vector<1x1x1xf32> to vector<1x1xf32>
    %19 = arith.mulf %16, %16 : vector<16x128xf32>
    %20 = vector.shape_cast %19 : vector<16x128xf32> to vector<1x16x128xf32>
    %cst_12 = arith.constant dense<0.000000e+00> : vector<1xf32>
    %21 = vector.multi_reduction <add>, %20, %cst_12 [1, 2] : vector<1x16x128xf32> to vector<1xf32>
    %22 = vector.shape_cast %21 : vector<1xf32> to vector<1x1x1xf32>
    %23 = vector.extract %22[0, 0, 0] : f32 from vector<1x1x1xf32>
    %24 = vector.broadcast %23 : f32 to vector<1x1xf32>
    %25 = arith.addf %18, %24 : vector<1x1xf32>
    %c0_13 = arith.constant 0 : index
    %c0_14 = arith.constant 0 : index
    %c0_15 = arith.constant 0 : index
    %26 = vector.load %arg5[%c0_13, %c0_14, %c0_15] : memref<1x1x1xf32, #tpu.memory_space<vmem>>, vector<1x1x1xf32>
    %27 = vector.shape_cast %26 : vector<1x1x1xf32> to vector<1x1xf32>
    %28 = vector.shape_cast %25 : vector<1x1xf32> to vector<1x1x1xf32>
    tpu.vector_store %arg5[%c0_13, %c0_14, %c0_15], %28 {strides = array<i32>} : memref<1x1x1xf32, #tpu.memory_space<vmem>>, vector<1x1x1xf32>,
    return
  }
  func.func @transform_0(%arg0: i32, %arg1: i32) -> (i32, i32, i32, i32) {
    %c0_i32 = arith.constant 0 : i32
    %c0_i32_0 = arith.constant 0 : i32
    %c0_i32_1 = arith.constant 0 : i32
    return %arg0, %arg1, %c0_i32, %c0_i32_0 : i32, i32, i32, i32
  }
  func.func @transform_1(%arg0: i32, %arg1: i32) -> (i32, i32) {
    %c0_i32 = arith.constant 0 : i32
    %c0_i32_0 = arith.constant 0 : i32
    %c0_i32_1 = arith.constant 0 : i32
    return %c0_i32, %c0_i32_0 : i32, i32
  }
  func.func @transform_2(%arg0: i32, %arg1: i32) -> (i32, i32) {
    %c0_i32 = arith.constant 0 : i32
    %c0_i32_0 = arith.constant 0 : i32
    %c0_i32_1 = arith.constant 0 : i32
    return %c0_i32, %c0_i32_0 : i32, i32
  }
  func.func @transform_3(%arg0: i32, %arg1: i32) -> (i32, i32, i32) {
    %c0_i32 = arith.constant 0 : i32
    %c0_i32_0 = arith.constant 0 : i32
    %c0_i32_1 = arith.constant 0 : i32
    return %arg0, %c0_i32, %c0_i32_0 : i32, i32, i32
  }
}

</mosaic_0001>

<bundles_post_ra>
// kernel: tpu_custom_call.1
= control target key start
LH: loop header
LB: loop body
LE: loop exit
PB: predicated region body
PF: predicated region fallthrough
CT: control target
= control target key end

     0   :  { %8 = vsyncpa [#allocation3], 0  ;;  %s688_s12 = smov 0   ;;  %s690_s13 = smov 0   ;;  %s769_s0 = inlined_call_operand.vmem [shape: f32[2,1,8,257], index: 0, kind: input, shape index: {}]   ;;  %s770_s1 = inlined_call_operand.vmem [shape: f32[32,16], index: 1, kind: input, shape index: {}]   ;;  %s771_s2 = inlined_call_operand.hbm [shape: f32[16,16], index: 2, kind: input, shape index: {}]   ;;  %s772_s3 = inlined_call_operand.vmem [shape: f32[2,1,1], index: 3, kind: output, shape index: {}]  }
   0x1   :  { %s692_s14 = smov 0  }
   0x2 LB: > { %s522_s15 = sadd.s32 4294967295, %s660_s14   ;;  %s26_s16 = sadd.s32 1, %s656_s13  ;;  %s660_s14 = sphi %s692_s14, %s14_s14   ;;  %s656_s13 = sphi %s690_s13, %s776_s13   ;;  %s652_s12 = sphi %s688_s12, %s775_s12  }
   0x3   : > { %p28_p0 = scmp.ge.s32.totalorder %s26_s16, 2  ;;  %p524_p1 = scmp.ge.s32.totalorder %s660_s14, 1 }
   0x4   : > { %p127_p2 = scmp.lt.s32.totalorder %s660_s14, 3  ;;  %p713_p4 = scmp.eq.s32.totalorder %s522_s15, 0 }
   0x5   : > { %s778_s16 = smov (%p28_p0, %s26_s16), 0  ;;  %s662_s19 = smov [#allocation2]  }
   0x6   : > { %p709_p3 = pnand %p524_p1, %p127_p2  ;;  %s142_s20 = sshll.u32 %s662_s19, 4  ;;  %s143_s20 = int_to_ptr.vmem [resolvable:$true] %s142_s20 }
   0x7   : > { %s619_s21 = scalar_lea.vmem %s143_s20, 256  ;;  %p627_p11 = scmp.lt.s32.totalorder %s143_s20, %s143_s20 }
   0x8   : > { %p572_p5 = pneg %p709_p3  ;;  %p620_p8 = scmp.ne.s32.totalorder %s143_s20, %s619_s21 }
   0x9   : > { %p628_p12 = scmp.lt.s32.totalorder %s619_s21, %s619_s21 }
   0xa   : > { %p573_p6 = pnand %p713_p4, %p572_p5 }
   0xb   : > { %p629_p13 = por %p628_p12, %p627_p11 }
   0xc   : > { %p610_p7 = pneg %p573_p6 }
   0xe   : > { %p622_p9 = pnand %p620_p8, %p610_p7 }
  0x10   : > { %p623_p10 = pneg %p622_p9 }
  0x12   : > { %p630_p0 = pnand %p629_p13, %p623_p10 }
  0x14   : > { %633 = shalt.err (!%p630_p0)
}
  0x15   : > { %s663_s22 = smov 128   ;;  %s664_s23 = smov 8  }
  0x16   : > { %575 = dma.hbm_to_vmem [thread:$0]  (!%p573_p6), %s771_s2, 256, %s143_s20, [#allocation3], %s663_s22, %s663_s22, %s664_s23  }
  0x17   : > { %170 = sbr.rel (%p709_p3) target bundleno = 889 (0x379), region = 32 }
  0x1c   : > { %647 = dma.done.wait (%p713_p4), [#allocation3], 256  }
  0x1d   : > { %649 = vsyncadd (%p713_p4), [#allocation3], 4294967040  ;;  %p196_p1 = scmp.lt.s32.totalorder %s652_s12, 1  ;;  %s665_s30 = smov 127   ;;  %v224_v3 = vld [vmem:[%s770_s1] sm:$0xff]  ;;  %vm241_vm0 = vcmask 130048  }
  0x1e   : > { %s666_s4 = smov 64   ;;  %552 = vmatprep.mubr.msk.f32.mxu0 %vm241_vm0, %v224_v3  ;;  %vm222_vm1 = vcmask 1039360   ;;  %vm236_vm2 = vcmask 523264   ;;  %v225_v12 = vld [vmem:[%s770_s1 + $0x8] sm:$0xff]  ;;  %v226_v13 = vld [vmem:[%s770_s1 + $0x10] sm:$0xff]  ;;  %v227_v14 = vld [vmem:[%s770_s1 + $0x18] sm:$0xff] }
  0x1f   : > { %s780_s12 = smov (!%p196_p1, %s652_s12), 1  ;;  %v345_v15 = vld [vmem:[#allocation2] sm:$0xff]  ;;  %v346_v26 = vld [vmem:[#allocation2 + $0x8] sm:$0xff]  ;;  %vm212_vm3 = vcmask 0   ;;  %v667_v32 = vmov 0.0  }
  0x20   : > { %s565_s26 = smul.u32 24, %s780_s12  ;;  %562 = vmatprep.mubr.msk.f32.mxu1 %vm241_vm0, %v345_v15  ;;  %s207_s19 = scalar_lea.vmem %s772_s3, %s780_s12 }
  0x21   : > { %213 = vst.msk [vmem:[%s207_s19] sm:$0x1] %vm212_vm3, %v667_v32 }
  0x22   : > { %s204_s29 = scalar_lea.vmem %s769_s0, %s565_s26 }
  0x23   : > { %v214_v0 = vld [vmem:[%s204_s29] sm:$0xff]  ;;  %v215_v1 = vld [vmem:[%s204_s29 + $0x8] sm:$0xff] }
  0x24   : > { %218 = vrot.lane.b32.xlu0 %v214_v0, %s665_s30 }
  0x28   : > { %220 = vrot.lane.b32.xlu0 %v215_v1, %s665_s30  ;;  %v428_v40 = vld [vmem:[%s207_s19] sm:$0x1] }
  0x2c   : > { %228 = vrot.lane.b32.xlu0 %v214_v0, %s666_s4 }
  0x96   : > { %v219_v2 = vpop.permute.xlu0 %218 }
  0x9a   : > { %v221_v4 = vpop.permute.xlu0 %220 }
  0x9b   : > { %234 = vrot.lane.b32.xlu1 %v221_v4, %s666_s4  ;;  %v223_v5 = vsel %vm222_vm1, %v219_v2, %v221_v4 }
  0x9e   : > { %v229_v9 = vpop.permute.xlu0 %228 }
  0x9f   : > { %232 = vrot.lane.b32.xlu1 %v223_v5, %s666_s4 }
  0xa3   : > { %230 = vrot.lane.b32.xlu1 %v215_v1, %s666_s4 }
 0x10d   : > { %v235_v6 = vpop.permute.xlu1 %234 }
 0x111   : > { %v233_v7 = vpop.permute.xlu1 %232 }
 0x112   : > { %v238_v8 = vsel %vm236_vm2, %v233_v7, %v235_v6 }
 0x113   : > { %548 = vmatprep.subr.mxu0 %v238_v8 }
 0x114   : > { %549 = vmatpush3.msra.mxu0 %v238_v8 }
 0x115   : > { %v231_v10 = vpop.permute.xlu1 %230 }
 0x116   : > { %v237_v11 = vsel %vm236_vm2, %v229_v9, %v231_v10 }
 0x117   : > { %550 = vmatprep.subr.mxu0 %v237_v11 }
 0x118   : > { %551 = vmatpush3.msra.mxu0 %v237_v11 }
 0x119   : > { %553 = vmatmul.mubr.msk.f32.vlgmr.msra.gmra.mxu0 %vm241_vm0, %v225_v12 }
 0x11a   : > { %555 = vmatprep.mubr.msk.f32.mxu0 %vm241_vm0, %v226_v13 }
 0x11d   : > { %556 = vmatmul.mubr.msk.f32.gmra.mxu0 %vm241_vm0, %v227_v14 }
 0x1d9   : > { %v554_v16 = vpop.f32.mrf.mxu0 }
 0x1da   : > { %v340_v19 = vmul.f32 %v554_v16, %v554_v16 }
 0x1db   : > { %v320_v17 = vpop.f32.mrf.mxu0 }
 0x1dc   : > { %v339_v22 = vmul.f32 %v320_v17, %v320_v17 }
 0x1dd   : > { %v557_v18 = vpop.f32.mrf.mxu0 }
 0x1de   : > { %v342_v20 = vmul.f32 %v557_v18, %v557_v18 }
 0x1df   : > { %v330_v21 = vpop.f32.mrf.mxu0 }
 0x1e0   : > { %v341_v23 = vmul.f32 %v330_v21, %v330_v21  ;;  %v344_v24 = vadd.f32 %v342_v20, %v340_v19 }
 0x1e2   : > { %v343_v25 = vadd.f32 %v341_v23, %v339_v22  ;;  %558 = vmatprep.subr.mxu1 %v344_v24 }
 0x1e3   : > { %559 = vmatpush3.msra.mxu1 %v344_v24 }
 0x1e4   : > { %560 = vmatprep.subr.mxu1 %v343_v25 }
 0x1e5   : > { %561 = vmatpush3.msra.mxu1 %v343_v25 }
 0x1e6   : > { %563 = vmatmul.mubr.msk.f32.vlgmr.msra.gmra.mxu1 %vm241_vm0, %v346_v26 }
 0x2a6   : > { %v564_v27 = vpop.f32.mrf.mxu1 }
 0x2a7   : > { %v430_v29 = vmul.f32 %v564_v27, %v564_v27 }
 0x2a8   : > { %v419_v28 = vpop.f32.mrf.mxu1 }
 0x2a9   : > { %v429_v30 = vmul.f32 %v419_v28, %v419_v28 }
 0x2ab   : > { %v431_v31 = vadd.f32 %v430_v29, %v429_v30 }
 0x2ad   : > { %432 = vadd.xlane.f32.xlu0 %v431_v31 }
 0x336   : > { %v433_v33 = vpop.xlane.xlu0 %432 }
 0x337   : > { %v434_v34 = vrot.slane %v433_v33, 4 }
 0x339   : > { %v435_v35 = vadd.f32 %v434_v34, %v433_v33 }
 0x33b   : > { %v436_v36 = vrot.slane %v435_v35, 2 }
 0x33d   : > { %v437_v37 = vadd.f32 %v436_v36, %v435_v35 }
 0x33f   : > { %v438_v38 = vrot.slane %v437_v37, 1 }
 0x341   : > { %v439_v39 = vadd.f32 %v438_v38, %v437_v37 }
 0x343   : > { %566 = vpush %v439_v39 }
 0x374   : > { %s567_s20 = spop %566 }
 0x375   : > { %v441_v41 = vstv %s567_s20 }
 0x376   : > { %v442_v42 = vadd.f32 %v441_v41, %v428_v40 }
 0x378   : > { %444 = vst.msk [vmem:[%s207_s19] sm:$0x1] %vm212_vm3, %v442_v42 }
 0x379 PF: > { %s14_s14 = sadd.s32 1, %s660_s14   ;;  %s775_s12 = smov %s656_s13 }
 0x37a   : > { %p11_p2 = scmp.ge.s32.totalorder %s14_s14, 4   ;;  %s776_s13 = smov %s778_s16 }
 0x37c   :  { %13 = sbr.rel (!%p11_p2) target bundleno = 2 (0x2), region = 71 }
 0x381   :  { %462 = vsyncpa [#allocation3], 1 }
 0x382   :  { %464 = vsyncpa [#allocation3 + $0x1], 1 }

</bundles_post_ra>
